<compile_context>
chip_gen: v6e
topology: v6e:2x2x1
jax: 0.10.0
libtpu: 0.0.40
codegen_flags: <defaults>
</compile_context>

<pallas_src>
import functools

import jax
import jax.numpy as jnp
import numpy as np
from jax.experimental import pallas as pl
from jax.experimental.pallas import tpu as pltpu

HIDDEN = 32
RESIDUE = 24
LN_EPS = 1e-12


def _gelu_tanh(x):
    # tanh-approximate GELU (ACT2FN["gelu_new"])
    return 0.5 * x * (1.0 + jnp.tanh(0.7978845608028654 * (x + 0.044715 * x * x * x)))


def predict_next_residues_kernel(x_ref, w1_ref, b1_ref, w2_ref, b2_ref, o_ref):
    """One (tm, H) row-tile of tokens, all params fully resident in VMEM.

    Computes y = LN_nogain(gelu(x @ W1 + b1)) @ W2' + b2', where the LayerNorm
    affine (gamma, beta) has been folded into W2'/b2' in the wrapper.
    """
    x = x_ref[...].astype(jnp.float32)

    # ---- dense: x @ W1 + b1 (MXU, whole K=32 contraction in one dot) ----
    h = jnp.dot(x, w1_ref[...], preferred_element_type=jnp.float32) + b1_ref[...]

    # ---- activation (f32; tanh lowers to the EUP) ----
    h = _gelu_tanh(h)

    # ---- LayerNorm stats, one pass: var = E[h^2] - mu^2 (clamped >= 0) ----
    mu = jnp.mean(h, axis=-1, keepdims=True)
    ex2 = jnp.mean(h * h, axis=-1, keepdims=True)
    var = jnp.maximum(ex2 - mu * mu, 0.0)
    hn = (h - mu) * jax.lax.rsqrt(var + LN_EPS)

    # ---- decoder: hn @ W2' + b2' (MXU), LN affine already folded in ----
    y = jnp.dot(hn, w2_ref[...], preferred_element_type=jnp.float32) + b2_ref[...]
    o_ref[...] = y.astype(o_ref.dtype)


def _choose_tm(n_rows: int) -> int:
    """Big row tiles (HBM-bound op, ~0.35us/grid-step overhead), but cap so the
    'parallel' grid axis keeps >=4 steps where possible (v7x has 2 TCs)."""
    target = 1024                                    # in the 512-2048 sweet spot
    cap = max(8, ((n_rows // 4) // 8) * 8)           # keep >=4 steps, mult of 8
    return max(8, min(target, cap))


@functools.partial(jax.jit, static_argnames=("tm",))
def _forward(x, w1, b1, gamma, beta, w2, b2, *, tm):
    B, S, H = x.shape
    N = B * S
    R = w2.shape[-1]

    # Fold the LayerNorm affine into the decoder (exact algebra, done at trace
    # time):  (hn*gamma + beta) @ W2 + b2 == hn @ (gamma[:,None]*W2) + (beta@W2 + b2)
    w2_f = gamma.reshape(H, 1) * w2
    b2_f = beta.reshape(1, H) @ w2 + b2.reshape(1, R)
    b1_r = b1.reshape(1, H)

    # Pad rows up to a multiple of tm; padded rows are computed then sliced off.
    n_pad = pl.cdiv(N, tm) * tm
    x2d = x.reshape(N, H)
    if n_pad != N:
        x2d = jnp.pad(x2d, ((0, n_pad - N), (0, 0)))

    # Whole-array, single-buffered VMEM residency for the small parameters.
    vmem_whole = pl.BlockSpec(memory_space=pltpu.MemorySpace.VMEM)

    out2d = pl.pallas_call(
        predict_next_residues_kernel,
        out_shape=jax.ShapeDtypeStruct((n_pad, R), x.dtype),
        grid_spec=pltpu.PrefetchScalarGridSpec(
            num_scalar_prefetch=0,
            grid=(n_pad // tm,),
            in_specs=[
                pl.BlockSpec((tm, H), lambda i: (i, 0)),  # x row-tile (pipelined)
                vmem_whole,                               # W1  [H, H]
                vmem_whole,                               # b1  [1, H]
                vmem_whole,                               # W2' [H, R] (gamma folded)
                vmem_whole,                               # b2' [1, R] (beta@W2 + bias)
            ],
            out_specs=pl.BlockSpec((tm, R), lambda i: (i, 0)),
        ),
        compiler_params=pltpu.CompilerParams(
            dimension_semantics=("parallel",)),
    )(x2d, w1, b1_r, w2_f, b2_f)

    return out2d[:N].reshape(B, S, R)


def anti_predict_next_residues(x, w1, b1, gamma, beta, w2, b2):
    """x: [B, S, H] float32. Returns [B, S, residue_size]."""
    # TODO(synk): inv_lang_adapter branch is not implemented (None in this forward).
    n_rows = x.shape[0] * x.shape[1]
    return _forward(x, w1, b1, gamma, beta, w2, b2, tm=_choose_tm(n_rows))


def _reference(x2d, w1, b1, gamma, beta, w2, b2):
    # Unfused reference mirroring the PyTorch module semantics.
    h = x2d @ w1 + b1.reshape(1, -1)
    h = _gelu_tanh(h)
    mu = h.mean(-1, keepdims=True)
    var = ((h - mu) ** 2).mean(-1, keepdims=True)
    h = (h - mu) / jnp.sqrt(var + LN_EPS) * gamma.reshape(1, -1) + beta.reshape(1, -1)
    return h @ w2 + b2.reshape(1, -1)


if __name__ == "__main__":
    key = jax.random.PRNGKey(0)
    k_x, k_w1, k_b1, k_g, k_bt, k_w2, k_x2 = jax.random.split(key, 7)

    H, R = HIDDEN, RESIDUE

    # Deterministic synthetic parameters (module __init__ shapes):
    #   dense:   Linear(H, H)  -> W1 [H, H] stored [in, out], b1 [H]
    #   LayerNorm(H)           -> gamma, beta [H]  (non-trivial so folding is exercised)
    #   decoder: Linear(H, R)  -> W2 [H, R] stored [in, out]
    #   self.bias = zeros(R)   -> b2 (tied to decoder.bias)
    w1 = jax.random.normal(k_w1, (H, H), dtype=jnp.float32) * (1.0 / np.sqrt(H))
    b1 = jax.random.normal(k_b1, (H,), dtype=jnp.float32) * 0.02
    gamma = 1.0 + 0.1 * jax.random.normal(k_g, (H,), dtype=jnp.float32)
    beta = 0.1 * jax.random.normal(k_bt, (H,), dtype=jnp.float32)
    w2 = jax.random.normal(k_w2, (H, R), dtype=jnp.float32) * (1.0 / np.sqrt(H))
    b2 = jnp.zeros((R,), dtype=jnp.float32)

    # Small main example: batch=2, seq=8, hidden=32 (N=16 -> tm=8, grid=2).
    B, S = 2, 8
    x = jax.random.normal(k_x, (B, S, H), dtype=jnp.float32)
    out = jax.block_until_ready(
        anti_predict_next_residues(x, w1, b1, gamma, beta, w2, b2))
    ref = _reference(x.reshape(-1, H), w1, b1, gamma, beta, w2, b2).reshape(B, S, R)
    np.testing.assert_allclose(np.asarray(out), np.asarray(ref), rtol=1e-5, atol=2e-5)

    # Second case exercising the row-padding path (N=400 -> tm=96, padded to 480).
    B2, S2 = 4, 100
    x2 = jax.random.normal(k_x2, (B2, S2, H), dtype=jnp.float32)
    out2 = jax.block_until_ready(
        anti_predict_next_residues(x2, w1, b1, gamma, beta, w2, b2))
    ref2 = _reference(x2.reshape(-1, H), w1, b1, gamma, beta, w2, b2).reshape(B2, S2, R)
    np.testing.assert_allclose(np.asarray(out2), np.asarray(ref2), rtol=1e-5, atol=2e-5)

    print("KERNEL_OK")
</pallas_src>

<mosaic_0001>
module attributes {stable_mosaic.version = 11 : i64} {
  func.func @predict_next_residues_kernel(%arg0: i32, %arg1: memref<8x32xf32, #tpu.memory_space<vmem>>, %arg2: memref<32x32xf32, #tpu.memory_space<vmem>>, %arg3: memref<1x32xf32, #tpu.memory_space<vmem>>, %arg4: memref<32x24xf32, #tpu.memory_space<vmem>>, %arg5: memref<1x24xf32, #tpu.memory_space<vmem>>, %arg6: memref<8x24xf32, #tpu.memory_space<vmem>>) attributes {dimension_semantics = [#tpu.dimension_semantics<parallel>], iteration_bounds = array<i64: 2>, scalar_prefetch = 0 : i64, scratch_operands = 0 : i64, tpu.core_type = #tpu.core_type<tc>, window_params = [{transform_indices = @transform_0, window_bounds = array<i64: 8, 32>}, {pipeline_mode = #tpu.pipeline_mode<synchronous>, transform_indices = @transform_1, window_bounds = array<i64: 32, 32>}, {pipeline_mode = #tpu.pipeline_mode<synchronous>, transform_indices = @transform_2, window_bounds = array<i64: 1, 32>}, {pipeline_mode = #tpu.pipeline_mode<synchronous>, transform_indices = @transform_3, window_bounds = array<i64: 32, 24>}, {pipeline_mode = #tpu.pipeline_mode<synchronous>, transform_indices = @transform_4, window_bounds = array<i64: 1, 24>}, {transform_indices = @transform_5, window_bounds = array<i64: 8, 24>}]} {
    %c0 = arith.constant 0 : index
    %c0_0 = arith.constant 0 : index
    %0 = vector.load %arg1[%c0, %c0_0] : memref<8x32xf32, #tpu.memory_space<vmem>>, vector<8x32xf32>
    %c0_1 = arith.constant 0 : index
    %c0_2 = arith.constant 0 : index
    %1 = vector.load %arg2[%c0_1, %c0_2] : memref<32x32xf32, #tpu.memory_space<vmem>>, vector<32x32xf32>
    %cst = arith.constant dense<0.000000e+00> : vector<8x32xf32>
    %2 = tpu.matmul %0, %1, %cst {dimension_numbers = #tpu.dot_dimension_numbers<[1], [0], [0], [1], [0, 0, 1, 1], [], []>} : vector<8x32xf32>, vector<32x32xf32>, vector<8x32xf32> -> vector<8x32xf32>
    %c0_3 = arith.constant 0 : index
    %c0_4 = arith.constant 0 : index
    %3 = vector.load %arg3[%c0_3, %c0_4] : memref<1x32xf32, #tpu.memory_space<vmem>>, vector<1x32xf32>
    %4 = vector.broadcast %3 : vector<1x32xf32> to vector<8x32xf32>
    %5 = arith.addf %2, %4 : vector<8x32xf32>
    %cst_5 = arith.constant 5.000000e-01 : f32
    %6 = vector.broadcast %cst_5 : f32 to vector<8x32xf32>
    %7 = arith.mulf %6, %5 : vector<8x32xf32>
    %cst_6 = arith.constant 4.471500e-02 : f32
    %8 = vector.broadcast %cst_6 : f32 to vector<8x32xf32>
    %9 = arith.mulf %8, %5 : vector<8x32xf32>
    %10 = arith.mulf %9, %5 : vector<8x32xf32>
    %11 = arith.mulf %10, %5 : vector<8x32xf32>
    %12 = arith.addf %5, %11 : vector<8x32xf32>
    %cst_7 = arith.constant 0.797884583 : f32
    %13 = vector.broadcast %cst_7 : f32 to vector<8x32xf32>
    %14 = arith.mulf %13, %12 : vector<8x32xf32>
    %15 = math.tanh %14 : vector<8x32xf32>
    %cst_8 = arith.constant 1.000000e+00 : f32
    %16 = vector.broadcast %cst_8 : f32 to vector<8x32xf32>
    %17 = arith.addf %16, %15 : vector<8x32xf32>
    %18 = arith.mulf %7, %17 : vector<8x32xf32>
    %cst_9 = arith.constant dense<0.000000e+00> : vector<8xf32>
    %19 = vector.multi_reduction <add>, %18, %cst_9 [1] : vector<8x32xf32> to vector<8xf32>
    %20 = vector.shape_cast %19 : vector<8xf32> to vector<8x1xf32>
    %cst_10 = arith.constant 3.200000e+01 : f32
    %21 = vector.broadcast %cst_10 : f32 to vector<8x1xf32>
    %22 = arith.divf %20, %21 : vector<8x1xf32>
    %23 = arith.mulf %18, %18 : vector<8x32xf32>
    %cst_11 = arith.constant dense<0.000000e+00> : vector<8xf32>
    %24 = vector.multi_reduction <add>, %23, %cst_11 [1] : vector<8x32xf32> to vector<8xf32>
    %25 = vector.shape_cast %24 : vector<8xf32> to vector<8x1xf32>
    %cst_12 = arith.constant 3.200000e+01 : f32
    %26 = vector.broadcast %cst_12 : f32 to vector<8x1xf32>
    %27 = arith.divf %25, %26 : vector<8x1xf32>
    %28 = arith.mulf %22, %22 : vector<8x1xf32>
    %29 = arith.subf %27, %28 : vector<8x1xf32>
    %cst_13 = arith.constant 0.000000e+00 : f32
    %30 = vector.broadcast %cst_13 : f32 to vector<8x1xf32>
    %31 = arith.maximumf %29, %30 : vector<8x1xf32>
    %32 = vector.broadcast %22 : vector<8x1xf32> to vector<8x32xf32>
    %33 = arith.subf %18, %32 : vector<8x32xf32>
    %cst_14 = arith.constant 9.99999996E-13 : f32
    %34 = vector.broadcast %cst_14 : f32 to vector<8x1xf32>
    %35 = arith.addf %31, %34 : vector<8x1xf32>
    %36 = math.rsqrt %35 : vector<8x1xf32>
    %37 = vector.broadcast %36 : vector<8x1xf32> to vector<8x32xf32>
    %38 = arith.mulf %33, %37 : vector<8x32xf32>
    %c0_15 = arith.constant 0 : index
    %c0_16 = arith.constant 0 : index
    %39 = vector.load %arg4[%c0_15, %c0_16] : memref<32x24xf32, #tpu.memory_space<vmem>>, vector<32x24xf32>
    %cst_17 = arith.constant dense<0.000000e+00> : vector<8x24xf32>
    %40 = tpu.matmul %38, %39, %cst_17 {dimension_numbers = #tpu.dot_dimension_numbers<[1], [0], [0], [1], [0, 0, 1, 1], [], []>} : vector<8x32xf32>, vector<32x24xf32>, vector<8x24xf32> -> vector<8x24xf32>
    %c0_18 = arith.constant 0 : index
    %c0_19 = arith.constant 0 : index
    %41 = vector.load %arg5[%c0_18, %c0_19] : memref<1x24xf32, #tpu.memory_space<vmem>>, vector<1x24xf32>
    %42 = vector.broadcast %41 : vector<1x24xf32> to vector<8x24xf32>
    %43 = arith.addf %40, %42 : vector<8x24xf32>
    %c0_20 = arith.constant 0 : index
    %c0_21 = arith.constant 0 : index
    %44 = vector.load %arg6[%c0_20, %c0_21] : memref<8x24xf32, #tpu.memory_space<vmem>>, vector<8x24xf32>
    tpu.vector_store %arg6[%c0_20, %c0_21], %43 {strides = array<i32>} : memref<8x24xf32, #tpu.memory_space<vmem>>, vector<8x24xf32>,
    return
  }
  func.func @transform_0(%arg0: i32) -> (i32, i32) {
    %c0_i32 = arith.constant 0 : i32
    %c0_i32_0 = arith.constant 0 : i32
    return %arg0, %c0_i32 : i32, i32
  }
  func.func @transform_1(%arg0: i32) -> (i32, i32) {
    %c0_i32 = arith.constant 0 : i32
    %c0_i32_0 = arith.constant 0 : i32
    %c0_i32_1 = arith.constant 0 : i32
    return %c0_i32, %c0_i32_0 : i32, i32
  }
  func.func @transform_2(%arg0: i32) -> (i32, i32) {
    %c0_i32 = arith.constant 0 : i32
    %c0_i32_0 = arith.constant 0 : i32
    %c0_i32_1 = arith.constant 0 : i32
    return %c0_i32, %c0_i32_0 : i32, i32
  }
  func.func @transform_3(%arg0: i32) -> (i32, i32) {
    %c0_i32 = arith.constant 0 : i32
    %c0_i32_0 = arith.constant 0 : i32
    %c0_i32_1 = arith.constant 0 : i32
    return %c0_i32, %c0_i32_0 : i32, i32
  }
  func.func @transform_4(%arg0: i32) -> (i32, i32) {
    %c0_i32 = arith.constant 0 : i32
    %c0_i32_0 = arith.constant 0 : i32
    %c0_i32_1 = arith.constant 0 : i32
    return %c0_i32, %c0_i32_0 : i32, i32
  }
  func.func @transform_5(%arg0: i32) -> (i32, i32) {
    %c0_i32 = arith.constant 0 : i32
    %c0_i32_0 = arith.constant 0 : i32
    return %arg0, %c0_i32 : i32, i32
  }
}

</mosaic_0001>

<bundles_post_ra>
// kernel: _forward.1
= control target key start
LH: loop header
LB: loop body
LE: loop exit
PB: predicated region body
PF: predicated region fallthrough
CT: control target
= control target key end

     0   :  { %10 = vsyncpa [#allocation3], 0  ;;  %s804_s0 = inlined_call_operand.vmem [shape: f32[16,32], index: 0, kind: input, shape index: {}]   ;;  %s805_s1 = inlined_call_operand.vmem [shape: f32[32,32], index: 1, kind: input, shape index: {}]   ;;  %s806_s2 = inlined_call_operand.vmem [shape: f32[1,32], index: 2, kind: input, shape index: {}]   ;;  %s807_s3 = inlined_call_operand.vmem [shape: f32[32,24], index: 3, kind: input, shape index: {}]   ;;  %s808_s4 = inlined_call_operand.vmem [shape: f32[1,24], index: 4, kind: input, shape index: {}]   ;;  %s809_s5 = inlined_call_operand.hbm [shape: f32[16,24], index: 5, kind: output, shape index: {}]  }
   0x1   :  { %12 = vsyncpa [#allocation3 + $0x1], 0  ;;  %s677_s18 = smov 0   ;;  %s679_s19 = smov 0  }
   0x2   :  { %s681_s20 = smov 0   ;;  %s683_s21 = smov 0  }
   0x3 LB: > { %s698_s22 = sadd.s32 4294967295, %s642_s21   ;;  %s491_s23 = sadd.s32 4294967294, %s642_s21   ;;  %s642_s21 = sphi %s683_s21, %s815_s21   ;;  %s638_s20 = sphi %s681_s20, %s814_s20   ;;  %s634_s19 = sphi %s679_s19, %s813_s19   ;;  %s630_s18 = sphi %s677_s18, %s812_s18  }
   0x4   : > { %s702_s24 = sadd.s32 1, %s642_s21   ;;  %s135_s25 = sadd.s32 1, %s638_s20 }
   0x5   : > { %s132_s26 = ssub.s32 %s642_s21, %s702_s24  ;;  %p145_p0 = scmp.ne.s32.totalorder %s638_s20, %s634_s19 }
   0x6   : > { %p133_p1 = scmp.eq.s32.totalorder %s132_s26, 0  ;;  %p146_p2 = scmp.eq.s32.totalorder %s698_s22, 1 }
   0x7   : > { %p151_p3 = scmp.ne.s32.totalorder %s634_s19, %s630_s18  ;;  %p152_p4 = scmp.eq.s32.totalorder %s491_s23, 1 }
   0x8   : > { %s713_s27 = scalar_select %p133_p1, %s638_s20, %s135_s25  }
   0x9   : > { %p715_p5 = por %p146_p2, %p145_p0  ;;  %p719_p6 = por %p152_p4, %p151_p3 }
   0xa   : > { %p494_p7 = scmp.ge.s32.totalorder %s642_s21, 1  ;;  %p189_p8 = scmp.lt.s32.totalorder %s642_s21, 3 }
   0xc   : > { %p190_p9 = pnand %p494_p7, %p189_p8 }
   0xd   : > { %p216_p10 = scmp.lt.s32.totalorder (!%p190_p9), %s698_s22, 1  ;;  %s502_s16 = sshll.u32 (!%p190_p9), %s698_s22, 7 }
   0xe   : > { %193 = sbr.rel (%p190_p9) target bundleno = 626 (0x272), region = 40  ;;  %s769_s30 = scalar_lea.hbm (!%p190_p9), %s809_s5, %s502_s16 }
  0x13   : > { %v224_v0 = vld [vmem:[%s805_s1 + $0x18] sm:$0xff]  ;;  %v644_v1 = vmov 0.0   ;;  %v223_v2 = vld [vmem:[%s805_s1 + $0x10] sm:$0xff]  ;;  %vm645_vm0 = vmmov 0   ;;  %s217_s9 = scalar_select %p216_p10, %s698_s22, 1  ;;  %v222_v3 = vld [vmem:[%s805_s1 + $0x8] sm:$0xff] }
  0x14   : > { %515 = vmatprep.subr.mxu0 %v644_v1  ;;  %523 = vmatprep.mubr.msk.f32.mxu0 %vm645_vm0, %v644_v1  ;;  %v221_v4 = vld [vmem:[%s805_s1] sm:$0xff]  ;;  %vm232_vm1 = vcmask 261120   ;;  %v335_v22 = vld [vmem:[%s807_s3 + $0x18] sm:$0xff]  ;;  %v334_v23 = vld [vmem:[%s807_s3 + $0x10] sm:$0xff]  ;;  %vm416_vm2 = vcmask 195584   ;;  %s646_s22 = smov [#allocation2]  }
  0x15   : > { %516 = vmatpush3.msra.mxu0 %v224_v0  ;;  %526 = vmatprep.subr.mxu1 %v644_v1  ;;  %s496_s12 = sshll.u32 %s217_s9, 3  ;;  %v497_v6 = vld [vmem:[%s806_s2] ss:$0 sm:$0xff]  ;;  %v333_v24 = vld [vmem:[%s807_s3 + $0x8] sm:$0xff]  ;;  %s586_s8 = sshll.u32 %s646_s22, 4  ;;  %s587_s8 = int_to_ptr.vmem [resolvable:$false] %s586_s8 }
  0x16   : > { %517 = vmatprep.subr.mxu0 %v644_v1  ;;  %534 = vmatprep.mubr.msk.f32.mxu1 %vm645_vm0, %v644_v1  ;;  %s219_s17 = scalar_lea.vmem %s804_s0, %s496_s12  ;;  %v332_v25 = vld [vmem:[%s807_s3] sm:$0xff]  ;;  %s213_s12 = sand.u32 1, %s634_s19  }
  0x17   : > { %518 = vmatpush3.msra.mxu0 %v223_v2  ;;  %v220_v5 = vld [vmem:[%s219_s17] sm:$0xff]  ;;  %527 = vmatpush3.msra.mxu1 %v335_v22  ;;  %s495_s13 = sshll.u32 %s213_s12, 3  ;;  %s419_s6 = scalar_lea.sflag [#allocation3], %s213_s12 }
  0x18   : > { %519 = vmatprep.subr.mxu0 %v644_v1  ;;  %528 = vmatprep.subr.mxu1 %v644_v1  ;;  %v499_v37 = vld [vmem:[%s808_s4] ss:$0 sm:$0xff]  ;;  %s215_s17 = scalar_lea.vmem [#allocation2], %s495_s13  ;;  %s588_s9 = scalar_lea.vmem %s587_s8, 256 }
  0x19   : > { %520 = vmatpush3.msra.mxu0 %v222_v3  ;;  %529 = vmatpush3.msra.mxu1 %v334_v23  ;;  %s432_s23 = sshll.u32 %s215_s17, 4  ;;  %s433_s23 = int_to_ptr.vmem [resolvable:$true] %s432_s23 }
  0x1a   : > { %521 = vmatprep.subr.mxu0 %v644_v1  ;;  %530 = vmatprep.subr.mxu1 %v644_v1  ;;  %s582_s7 = scalar_lea.vmem %s433_s23, 128  ;;  %p589_p0 = scmp.lt.s32.totalorder %s433_s23, %s587_s8 }
  0x1b   : > { %522 = vmatpush3.msra.mxu0 %v221_v4  ;;  %531 = vmatpush3.msra.mxu1 %v333_v24  ;;  %p583_p11 = scmp.ne.s32.totalorder %s433_s23, %s582_s7  ;;  %p590_p1 = scmp.lt.s32.totalorder %s588_s9, %s582_s7 }
  0x1c   : > { %524 = vmatmul.mubr.msk.f32.vlgmr.msra.gmra.mxu0 %vm232_vm1, %v220_v5  ;;  %532 = vmatprep.subr.mxu1 %v644_v1 }
  0x1d   : > { %533 = vmatpush3.msra.mxu1 %v332_v25  ;;  %p584_p12 = pnand %p583_p11, %p715_p5  ;;  %p591_p2 = por %p590_p1, %p589_p0 }
  0x1f   : > { %p585_p13 = pneg %p584_p12 }
  0x21   : > { %p592_p3 = pnand %p591_p2, %p585_p13 }
  0xdc   : > { %v302_v7 = vpop.f32.mrf.mxu0 }
  0xdd   : > { %v303_v8 = vadd.f32 %v497_v6, %v302_v7 }
  0xde   : > { %v525_v9 = vpop.f32.mrf.mxu0 }
  0xdf   : > { %v307_v10 = vmul.f32 0.044715, %v303_v8  ;;  %v306_v16 = vmul.f32 0.5, %v303_v8 }
  0xe1   : > { %v308_v11 = vmul.f32 %v307_v10, %v303_v8 }
  0xe3   : > { %v309_v12 = vmul.f32 %v308_v11, %v303_v8 }
  0xe5   : > { %v310_v13 = vadd.f32 %v309_v12, %v303_v8 }
  0xe7   : > { %v311_v14 = vmul.f32 0.7978846, %v310_v13 }
  0xe9   : > { %578 = vtanh.f32 %v311_v14 }
  0xf6   : > { %v579_v15 = vpop.eup %578 }
  0xf7   : > { %v313_v17 = vadd.f32 1.0, %v579_v15 }
  0xf9   : > { %v314_v18 = vmul.f32 %v313_v17, %v306_v16 }
  0xfb   : > { %v315_v19 = vsel %vm232_vm1, %v314_v18, 0.0  ;;  %v320_v20 = vmul.f32 %v314_v18, %v314_v18 }
  0xfc   : > { %316 = vadd.xlane.f32.xlu0 %v315_v19 }
  0xfd   : > { %v321_v21 = vsel %vm232_vm1, %v320_v20, 0.0 }
 0x100   : > { %322 = vadd.xlane.f32.xlu0 %v321_v21 }
 0x185   : > { %v317_v26 = vpop.xlane.xlu0 %316 }
 0x186   : > { %v319_v27 = vmul.f32 0.03125, %v317_v26 }
 0x188   : > { %v325_v29 = vmul.f32 %v319_v27, %v319_v27  ;;  %v328_v34 = vsub.f32 %v314_v18, %v319_v27 }
 0x189   : > { %v323_v28 = vpop.xlane.xlu0 %322 }
 0x18a   : > { %v324_v30 = vmul.f32 0.03125, %v323_v28 }
 0x18c   : > { %v326_v31 = vsub.f32 %v324_v30, %v325_v29 }
 0x18e   : > { %v327_v32 = vmax.f32 %v326_v31, 0.0 }
 0x190   : > { %v329_v33 = vadd.f32 1e-12, %v327_v32 }
 0x192   : > { %580 = vrsqrt.f32 %v329_v33 }
 0x19f   : > { %v581_v35 = vpop.eup %580 }
 0x1a0   : > { %v331_v36 = vmul.f32 %v581_v35, %v328_v34 }
 0x1a2   : > { %535 = vmatmul.mubr.msk.f32.vlgmr.msra.gmra.mxu1 %vm232_vm1, %v331_v36 }
 0x262   : > { %v412_v38 = vpop.f32.mrf.mxu1 }
 0x263   : > { %v413_v39 = vadd.f32 %v499_v37, %v412_v38 }
 0x264   : > { %v536_v40 = vpop.f32.mrf.mxu1 }
 0x265   : > { %417 = vst.msk [vmem:[%s215_s17] sm:$0xff] %vm416_vm2, %v413_v39 }
 0x266   : > { %595 = shalt.err (!%p592_p3)
}
 0x267   : > { %s596_s10 = scalar_lea.hbm %s769_s30, 128  ;;  %s600_s13 = scalar_lea.hbm %s809_s5, 256 }
 0x268   : > { %p597_p4 = scmp.ne.s32.totalorder %s769_s30, %s596_s10  ;;  %p601_p9 = scmp.lt.s32.totalorder %s769_s30, %s809_s5 }
 0x269   : > { %p602_p10 = scmp.lt.s32.totalorder %s600_s13, %s596_s10 }
 0x26a   : > { %p598_p7 = pnand %p597_p4, %p715_p5 }
 0x26b   : > { %p603_p11 = por %p602_p10, %p601_p9 }
 0x26c   : > { %p599_p8 = pneg %p598_p7 }
 0x26e   : > { %p604_p12 = pnand %p603_p11, %p599_p8 }
 0x270   : > { %607 = shalt.err (!%p604_p12)
}
 0x271   : > { %537 = dma.vmem_to_hbm [thread:$0]  (%p715_p5), %s433_s23, 128, %s769_s30, %s419_s6  }
 0x272 PF: > { %p543_p13 = scmp.ge.s32.totalorder %s642_s21, 2  ;;  %s444_s16 = sand.u32 1, %s630_s18  }
 0x273   : > { %s445_s17 = scalar_lea.sflag [#allocation3], %s444_s16 }
 0x274   : > { %p540_p0 = pnand %p543_p13, %p719_p6 }
 0x276   : > { %p541_p1 = pneg %p540_p0 }
 0x278   : > { %625 = dma.done.wait (%p541_p1), %s445_s17, 128  }
 0x279   : > { %627 = vsyncadd (%p541_p1), %s445_s17, 4294967168  ;;  %p15_p2 = scmp.ge.s32.totalorder %s702_s24, 4   ;;  %s812_s18 = smov %s634_s19 }
 0x27a   : > { %s813_s19 = smov %s638_s20  ;;  %s814_s20 = smov %s713_s27 }
 0x27b   : > { %s815_s21 = smov %s702_s24  ;;  %17 = sbr.rel (!%p15_p2) target bundleno = 3 (0x3), region = 75 }
 0x280   :  { %450 = vsyncpa [#allocation3], 1 }
 0x281   :  { %452 = vsyncpa [#allocation3 + $0x1], 1 }

</bundles_post_ra>
